<compile_context>
chip_gen: v7x
topology: tpu7x:2x2x1
jax: 0.10.0
libtpu: 0.0.40
codegen_flags: <defaults>
</compile_context>

<pallas_src>
import functools

import jax
import jax.numpy as jnp
from jax import lax
from jax.experimental import pallas as pl
from jax.experimental.pallas import tpu as pltpu


# ---------------------------------------------------------------------------
# Kernels
# ---------------------------------------------------------------------------
def _finalize(h, b1_ref, w2_ref, b2_ref, o_ref, proj_on_mxu):
    """bias + ReLU + hidden->1 projection + sigmoid; h is (H, TILE_B) f32."""
    h = jnp.maximum(h + b1_ref[...], 0.0)                         # VPU, f32
    if proj_on_mxu:
        # (1, H) @ (H, TILE_B) on the (otherwise mostly idle) MXU.
        z = jnp.dot(w2_ref[...], h, preferred_element_type=jnp.float32)
    else:
        # broadcast-mul (VPU) + sublane reduce (XLU); keeps the MXU free.
        z = jnp.sum(h * w2_ref[...], axis=0, keepdims=True)       # (1, TILE_B)
    z = z + b2_ref[...]
    # sigmoid: exp on the EUP + approximate reciprocal (EUP slot, ~1e-4 abs err)
    o_ref[...] = (pl.reciprocal(1.0 + jnp.exp(-z), approx=True)).astype(o_ref.dtype)


def _mlp_kernel(x_ref, w1_ref, b1_ref, w2_ref, b2_ref, o_ref, *, proj_on_mxu):
    # Single-K path: whole D_in contraction in one block.
    # x_ref: (TILE_B, D_in) natural layout. Contracting dim 1 of both operands
    # gives (H, TILE_B): batch stays on the lane axis -> lane-dense output.
    h = lax.dot_general(w1_ref[...], x_ref[...],
                        dimension_numbers=(((1,), (1,)), ((), ())),
                        preferred_element_type=jnp.float32)       # (H, TILE_B)
    _finalize(h, b1_ref, w2_ref, b2_ref, o_ref, proj_on_mxu)


def _mlp_kernel_ktiled(x_ref, w1_ref, b1_ref, w2_ref, b2_ref, o_ref, acc_ref, *,
                       proj_on_mxu):
    # K-tiled path: accumulate (H, TILE_B) partials over the d_in grid axis.
    k = pl.program_id(1)

    @pl.when(k == 0)
    def _():
        acc_ref[...] = jnp.zeros_like(acc_ref)

    acc_ref[...] += lax.dot_general(x_ref[...], w1_ref[...],
                                    dimension_numbers=(((1,), (1,)), ((), ())),
                                    preferred_element_type=jnp.float32).T \
        if False else lax.dot_general(w1_ref[...], x_ref[...],
                                      dimension_numbers=(((1,), (1,)), ((), ())),
                                      preferred_element_type=jnp.float32)

    @pl.when(k == pl.num_programs(1) - 1)
    def _():
        _finalize(acc_ref[...], b1_ref, w2_ref, b2_ref, o_ref, proj_on_mxu)


# ---------------------------------------------------------------------------
# Tiling heuristic
# ---------------------------------------------------------------------------
def _choose_tiling(B, d_in, H, itemsize, budget_bytes):
    """Pick (tile_b, tile_k). tile_k equals d_in or is a ×128 divisor of it."""

    def footprint(tb, tk):
        return (2 * tb * tk * itemsize          # x block, double-buffered
                + 2 * H * tk * itemsize         # W1 block, double-buffered
                + tb * H * 4                    # f32 (H, tile_b) intermediate/acc
                + 2 * tb * 4                    # (1, tile_b) output block
                + 4 * H * 4 + 4096)             # b1 / w2 / b2 + slack

    def k_candidates():                          # descending: prefer no K-tiling
        cands = [d_in]
        c = 128
        while c < d_in:
            if d_in % c == 0:
                cands.append(c)
            c += 128
        return sorted(set(cands), reverse=True)

    if B <= 256:
        for tk in k_candidates():
            if footprint(B, tk) <= budget_bytes:
                return B, tk
        # TODO(synk): shapes this large would also need H tiling; fall back to
        # the smallest K tile and let vmem_limit_bytes absorb the overshoot.
        return B, k_candidates()[-1]

    def max_tb(tk):
        num = budget_bytes - 2 * H * tk * itemsize - 4 * H * 4 - 4096
        den = 2 * tk * itemsize + H * 4 + 2 * 4
        return max(num // den, 0)

    cands = k_candidates()
    tk, tb = cands[0], max_tb(cands[0])
    for c in cands:
        t = max_tb(c)
        if t >= 512:
            tk, tb = c, t
            break
        if t > tb:
            tk, tb = c, t

    tb = min(int(tb), 4096) // 128 * 128
    tb = max(tb, 128)
    # keep >=2 batch tiles so v7x megacore ("parallel") can use both TensorCores
    tb = min(tb, max(128, (B - 1) // 128 * 128))
    return tb, tk


# ---------------------------------------------------------------------------
# Wrapper
# ---------------------------------------------------------------------------
def act_1_forward(x, w1, b1, w2, b2, *, bf16_matmul=True,
                  tile_b=None, tile_k=None,
                  vmem_limit_bytes=48 * 1024 * 1024):
    """Forward pass of act_1.

    x : (B, D_in)
    w1: (H, D_in)   -- nn.Linear(input_size, hidden_size).weight layout
    b1: (H,)
    w2: (1, H)      -- nn.Linear(hidden_size, 1).weight layout
    b2: (1,)
    returns (B, 1)
    """
    B, d_in = x.shape
    H = w1.shape[0]
    out_dtype = x.dtype

    # bf16 MXU operands by default; accumulation and elementwise math stay f32.
    mxu_dtype = jnp.bfloat16 if bf16_matmul else jnp.float32
    xk = x if x.dtype == mxu_dtype else x.astype(mxu_dtype)
    w1k = w1 if w1.dtype == mxu_dtype else w1.astype(mxu_dtype)
    itemsize = jnp.dtype(mxu_dtype).itemsize

    budget = int(vmem_limit_bytes * 0.8)
    tb_auto, tk_auto = _choose_tiling(B, d_in, H, itemsize, budget)
    tb = tb_auto if tile_b is None else int(tile_b)
    tk = tk_auto if tile_k is None else int(tile_k)
    if tb != B and (tb <= 0 or tb % 128 != 0):
        raise ValueError("tile_b must equal B or be a positive multiple of 128")
    if tk != d_in and (tk % 128 != 0 or d_in % tk != 0):
        raise ValueError("tile_k must equal d_in or be a ×128 divisor of d_in")

    num_b = pl.cdiv(B, tb)
    num_k = 1 if tk == d_in else d_in // tk

    proj_on_mxu = H >= 2 * d_in
    b1c = b1.reshape(H, 1).astype(jnp.float32)
    w2c = (w2.reshape(1, H) if proj_on_mxu else w2.reshape(H, 1)).astype(jnp.float32)
    b2c = b2.reshape(1, 1).astype(jnp.float32)

    in_specs = [
        pl.BlockSpec((tb, tk), lambda i, k: (i, k)),       # x: streamed, natural layout
        pl.BlockSpec((H, tk), lambda i, k: (0, k)),        # W1: VMEM-resident per K-block
        pl.BlockSpec((H, 1), lambda i, k: (0, 0)),         # b1: resident
        pl.BlockSpec(w2c.shape, lambda i, k: (0, 0)),      # W2: resident
        pl.BlockSpec((1, 1), lambda i, k: (0, 0)),         # b2: resident
    ]
    out_spec = pl.BlockSpec((1, tb), lambda i, k: (0, i))  # lane-dense output slab

    if num_k == 1:
        kernel = functools.partial(_mlp_kernel, proj_on_mxu=proj_on_mxu)
        scratch = []
    else:
        kernel = functools.partial(_mlp_kernel_ktiled, proj_on_mxu=proj_on_mxu)
        scratch = [pltpu.VMEM((H, tb), jnp.float32)]

    flops = 2 * B * d_in * H + 2 * B * H + 4 * B * H
    bytes_accessed = (B * d_in * itemsize + H * d_in * itemsize
                      + (2 * H + 1) * 4 + B * jnp.dtype(out_dtype).itemsize)

    out = pl.pallas_call(
        kernel,
        out_shape=jax.ShapeDtypeStruct((1, B), out_dtype),
        grid_spec=pltpu.PrefetchScalarGridSpec(
            num_scalar_prefetch=0,
            grid=(num_b, num_k),
            in_specs=in_specs,
            out_specs=out_spec,
            scratch_shapes=scratch,
        ),
        compiler_params=pltpu.CompilerParams(
            dimension_semantics=("parallel", "arbitrary"),   # batch parallel, K reduction
            vmem_limit_bytes=int(vmem_limit_bytes)),
        cost_estimate=pl.CostEstimate(
            flops=int(flops), transcendentals=int(B),
            bytes_accessed=int(bytes_accessed)),
    )(xk, w1k, b1c, w2c, b2c)

    return out.reshape(B, 1)


# ---------------------------------------------------------------------------
# Reference + init
# ---------------------------------------------------------------------------
def act_1_reference(x, w1, b1, w2, b2):
    h = jnp.maximum(x @ w1.T + b1, 0.0)
    return jax.nn.sigmoid(h @ w2.T + b2)


def init_params(key, input_size, hidden_size):
    # PyTorch default nn.Linear init, weights in (out_features, in_features).
    k1, k2, k3, k4 = jax.random.split(key, 4)
    bound1 = 1.0 / jnp.sqrt(jnp.float32(input_size))
    bound2 = 1.0 / jnp.sqrt(jnp.float32(hidden_size))
    w1 = jax.random.uniform(k1, (hidden_size, input_size), jnp.float32, -bound1, bound1)
    b1 = jax.random.uniform(k2, (hidden_size,), jnp.float32, -bound1, bound1)
    w2 = jax.random.uniform(k3, (1, hidden_size), jnp.float32, -bound2, bound2)
    b2 = jax.random.uniform(k4, (1,), jnp.float32, -bound2, bound2)
    return w1, b1, w2, b2


if __name__ == "__main__":
    key = jax.random.PRNGKey(0)
    ks = jax.random.split(key, 6)

    # --- test 1: tiny shapes (single block, MXU hidden->1 projection path) ---
    B1, D1, H1 = 8, 16, 32
    x1 = jax.random.normal(ks[0], (B1, D1), jnp.float32)
    p1 = init_params(ks[1], D1, H1)
    ref1 = act_1_reference(x1, *p1)
    out1 = jax.block_until_ready(act_1_forward(x1, *p1))                      # bf16 default
    out1f = jax.block_until_ready(act_1_forward(x1, *p1, bf16_matmul=False))  # f32 MXU
    assert out1.shape == (B1, 1) and out1f.shape == (B1, 1)
    assert jnp.allclose(out1, ref1, atol=2e-2, rtol=2e-2)
    assert jnp.allclose(out1f, ref1, atol=5e-3, rtol=5e-3)

    # --- test 2: ragged tiled batch (2 tiles of 256 for B=300), no padding ---
    B2, D2, H2 = 300, 128, 256
    x2 = jax.random.normal(ks[2], (B2, D2), jnp.float32)
    p2 = init_params(ks[3], D2, H2)
    ref2 = act_1_reference(x2, *p2)
    out2 = jax.block_until_ready(act_1_forward(x2, *p2))
    out2f = jax.block_until_ready(act_1_forward(x2, *p2, bf16_matmul=False))
    assert out2.shape == (B2, 1)
    assert jnp.allclose(out2, ref2, atol=2e-2, rtol=2e-2)
    assert jnp.allclose(out2f, ref2, atol=5e-3, rtol=5e-3)

    # --- test 3: forced K-tiled accumulator path + VPU hidden->1 projection ---
    B3, D3, H3 = 300, 256, 64
    x3 = jax.random.normal(ks[4], (B3, D3), jnp.float32)
    p3 = init_params(ks[5], D3, H3)
    ref3 = act_1_reference(x3, *p3)
    out3 = jax.block_until_ready(
        act_1_forward(x3, *p3, bf16_matmul=False, tile_k=128))
    assert out3.shape == (B3, 1)
    assert jnp.allclose(out3, ref3, atol=5e-3, rtol=5e-3)

    print("KERNEL_OK")
</pallas_src>

<mosaic_0001>
module attributes {stable_mosaic.version = 11 : i64} {
  func.func @_mlp_kernel(%arg0: i32, %arg1: i32, %arg2: memref<8x16xbf16, #tpu.memory_space<vmem>>, %arg3: memref<32x16xbf16, #tpu.memory_space<vmem>>, %arg4: memref<32x1xf32, #tpu.memory_space<vmem>>, %arg5: memref<1x32xf32, #tpu.memory_space<vmem>>, %arg6: memref<1x1xf32, #tpu.memory_space<vmem>>, %arg7: memref<1x8xf32, #tpu.memory_space<vmem>>) attributes {dimension_semantics = [#tpu.dimension_semantics<parallel>, #tpu.dimension_semantics<arbitrary>], iteration_bounds = array<i64: 1, 1>, scalar_prefetch = 0 : i64, scratch_operands = 0 : i64, tpu.core_type = #tpu.core_type<tc>, window_params = [{transform_indices = @transform_0, window_bounds = array<i64: 8, 16>}, {transform_indices = @transform_1, window_bounds = array<i64: 32, 16>}, {pipeline_mode = #tpu.pipeline_mode<synchronous>, transform_indices = @transform_2, window_bounds = array<i64: 32, 1>}, {pipeline_mode = #tpu.pipeline_mode<synchronous>, transform_indices = @transform_3, window_bounds = array<i64: 1, 32>}, {pipeline_mode = #tpu.pipeline_mode<synchronous>, transform_indices = @transform_4, window_bounds = array<i64: 1, 1>}, {transform_indices = @transform_5, window_bounds = array<i64: 1, 8>}]} {
    %c0 = arith.constant 0 : index
    %c0_0 = arith.constant 0 : index
    %0 = vector.load %arg3[%c0, %c0_0] : memref<32x16xbf16, #tpu.memory_space<vmem>>, vector<32x16xbf16>
    %c0_1 = arith.constant 0 : index
    %c0_2 = arith.constant 0 : index
    %1 = vector.load %arg2[%c0_1, %c0_2] : memref<8x16xbf16, #tpu.memory_space<vmem>>, vector<8x16xbf16>
    %cst = arith.constant dense<0.000000e+00> : vector<32x8xf32>
    %2 = tpu.matmul %0, %1, %cst {dimension_numbers = #tpu.dot_dimension_numbers<[1], [1], [0], [0], [0, 0, 1, 0], [], []>} : vector<32x16xbf16>, vector<8x16xbf16>, vector<32x8xf32> -> vector<32x8xf32>
    %c0_3 = arith.constant 0 : index
    %c0_4 = arith.constant 0 : index
    %3 = vector.load %arg4[%c0_3, %c0_4] : memref<32x1xf32, #tpu.memory_space<vmem>>, vector<32x1xf32>
    %4 = vector.broadcast %3 : vector<32x1xf32> to vector<32x8xf32>
    %5 = arith.addf %2, %4 : vector<32x8xf32>
    %cst_5 = arith.constant 0.000000e+00 : f32
    %6 = vector.broadcast %cst_5 : f32 to vector<32x8xf32>
    %7 = arith.maximumf %5, %6 : vector<32x8xf32>
    %c0_6 = arith.constant 0 : index
    %c0_7 = arith.constant 0 : index
    %8 = vector.load %arg5[%c0_6, %c0_7] : memref<1x32xf32, #tpu.memory_space<vmem>>, vector<1x32xf32>
    %cst_8 = arith.constant dense<0.000000e+00> : vector<1x8xf32>
    %9 = tpu.matmul %8, %7, %cst_8 {dimension_numbers = #tpu.dot_dimension_numbers<[1], [0], [0], [1], [0, 0, 1, 1], [], []>} : vector<1x32xf32>, vector<32x8xf32>, vector<1x8xf32> -> vector<1x8xf32>
    %c0_9 = arith.constant 0 : index
    %c0_10 = arith.constant 0 : index
    %10 = vector.load %arg6[%c0_9, %c0_10] : memref<1x1xf32, #tpu.memory_space<vmem>>, vector<1x1xf32>
    %11 = vector.broadcast %10 : vector<1x1xf32> to vector<1x8xf32>
    %12 = arith.addf %9, %11 : vector<1x8xf32>
    %cst_11 = arith.constant 0.000000e+00 : f32
    %13 = vector.broadcast %cst_11 : f32 to vector<1x8xf32>
    %14 = arith.subf %13, %12 : vector<1x8xf32>
    %15 = math.exp %14 : vector<1x8xf32>
    %cst_12 = arith.constant 1.000000e+00 : f32
    %16 = vector.broadcast %cst_12 : f32 to vector<1x8xf32>
    %17 = arith.addf %16, %15 : vector<1x8xf32>
    %18 = tpu.reciprocal %17 {approx = true} : vector<1x8xf32> -> vector<1x8xf32>
    %c0_13 = arith.constant 0 : index
    %c0_14 = arith.constant 0 : index
    %19 = vector.load %arg7[%c0_13, %c0_14] : memref<1x8xf32, #tpu.memory_space<vmem>>, vector<1x8xf32>
    tpu.vector_store %arg7[%c0_13, %c0_14], %18 {strides = array<i32>} : memref<1x8xf32, #tpu.memory_space<vmem>>, vector<1x8xf32>,
    return
  }
  func.func @transform_0(%arg0: i32, %arg1: i32) -> (i32, i32) {
    %c0_i32 = arith.constant 0 : i32
    return %arg0, %arg1 : i32, i32
  }
  func.func @transform_1(%arg0: i32, %arg1: i32) -> (i32, i32) {
    %c0_i32 = arith.constant 0 : i32
    %c0_i32_0 = arith.constant 0 : i32
    return %c0_i32, %arg1 : i32, i32
  }
  func.func @transform_2(%arg0: i32, %arg1: i32) -> (i32, i32) {
    %c0_i32 = arith.constant 0 : i32
    %c0_i32_0 = arith.constant 0 : i32
    %c0_i32_1 = arith.constant 0 : i32
    return %c0_i32, %c0_i32_0 : i32, i32
  }
  func.func @transform_3(%arg0: i32, %arg1: i32) -> (i32, i32) {
    %c0_i32 = arith.constant 0 : i32
    %c0_i32_0 = arith.constant 0 : i32
    %c0_i32_1 = arith.constant 0 : i32
    return %c0_i32, %c0_i32_0 : i32, i32
  }
  func.func @transform_4(%arg0: i32, %arg1: i32) -> (i32, i32) {
    %c0_i32 = arith.constant 0 : i32
    %c0_i32_0 = arith.constant 0 : i32
    %c0_i32_1 = arith.constant 0 : i32
    return %c0_i32, %c0_i32_0 : i32, i32
  }
  func.func @transform_5(%arg0: i32, %arg1: i32) -> (i32, i32) {
    %c0_i32 = arith.constant 0 : i32
    %c0_i32_0 = arith.constant 0 : i32
    return %c0_i32, %arg0 : i32, i32
  }
}

</mosaic_0001>

<bundles_post_ra>
// kernel: tpu_custom_call.1
= control target key start
LH: loop header
LB: loop body
LE: loop exit
PB: predicated region body
PF: predicated region fallthrough
CT: control target
= control target key end

     0   :  { %s384_s0 = inlined_call_operand.vmem [shape: bf16[8,16], index: 0, kind: input, shape index: {}]   ;;  %s385_s1 = inlined_call_operand.vmem [shape: bf16[32,16], index: 1, kind: input, shape index: {}]   ;;  %s386_s2 = inlined_call_operand.vmem [shape: f32[32,1], index: 2, kind: input, shape index: {}]   ;;  %s387_s3 = inlined_call_operand.vmem [shape: f32[1,32], index: 3, kind: input, shape index: {}]   ;;  %s388_s4 = inlined_call_operand.<no memory space> [shape: f32[1,1], index: 4, kind: input, shape index: {}]   ;;  %s389_s5 = inlined_call_operand.hbm [shape: f32[1,8], index: 5, kind: output, shape index: {}]  }
   0x1   :  { %v10_v0 = vstv %s388_s4 }
   0x2   :  { %11 = vst [vmem:[#allocation2] sm:$0x1] %v10_v0 }
   0x3   :  { %v28_v1 = vld [vmem:[%s384_s0] sm:$0xf]  ;;  %vm63_vm0 = vcmask 130048   ;;  %v306_v5 = vmov 0   ;;  %v31_v6 = vld [vmem:[%s386_s2 + $0x10] sm:$0xff] }
   0x4   :  { %v276_v2 = vld [vmem:[%s385_s1] sm:$0xff]   ;;  %268 = vmatprep.subr.msk.bf16.mxu0 %vm63_vm0, %v28_v1  ;;  %v71_v3 = vsel %vm63_vm0, %v28_v1, 0  ;;  %274 = vset.pattern.permute.xlu0 %v306_v5 }
   0x5   :  { %246 = vmatpush3.bf16.xpose.msra.mxu0 %v71_v3  ;;  %247 = vmatprep.mubr.msk.bf16.mxu0 %vm63_vm0, %v276_v2  ;;  %v29_v4 = vld [vmem:[%s386_s2] sm:$0xff] }
   0x6   :  { %275 = vset.pattern.permute.xlu1 %v306_v5  ;;  %35 = vperm.xlu0 %274, %v29_v4  }
   0x7   :  { %45 = vperm.xlu1 %275, %v31_v6  }
   0x8   :  { %12 = vsyncpa [#allocation4], 0  ;;  %v277_v7 = vld [vmem:[%s385_s1 + $0x8] sm:$0xff]   ;;  %v32_v9 = vld [vmem:[%s386_s2 + $0x18] sm:$0xff]  ;;  %v307_v11 = vmov 0.0|0.0   ;;  %vm308_vm1 = vmmov 0   ;;  %v133_v32 = vlaneseq }
   0x9   :  { %v30_v8 = vld [vmem:[%s386_s2 + $0x8] sm:$0xff]  ;;  %v127_v10 = vld [vmem:[#allocation2] sm:$0x1]  ;;  %262 = vmatprep.subr.bf16.mxu1 %v307_v11  ;;  %v309_v12 = vmov 0.0   ;;  %vm137_vm2 = vcmask 261120   ;;  %s310_s7 = smov [#allocation3]  }
   0xa   :  { %40 = vperm.xlu0 %274, %v30_v8   ;;  %259 = vmatprep.mubr.msk.f32.mxu1 %vm308_vm1, %v309_v12  ;;  %v126_v31 = vld [vmem:[%s387_s3] sm:$0x1]  ;;  %v134_v33 = vshrl.u32 %v133_v32, 7  ;;  %s224_s8 = sshll.u32 %s310_s7, 4  ;;  %vm216_vm3 = vcmask 57344   ;;  %s225_s8 = int_to_ptr.vmem [resolvable:$true] %s224_s8 }
   0xb   :  { %50 = vperm.xlu1 %275, %v32_v9   ;;  %s282_s3 = scalar_lea.vmem %s225_s8, 16  ;;  %s286_s9 = scalar_lea.vmem %s225_s8, 32 }
   0xc   :  { %248 = vmatmul.mubr.msk.bf16.vlgmr.msra.gmra.mrb[0].mxu0 %vm63_vm0, %v277_v7  ;;  %v135_v34 = vsub.s32 0, %v134_v33  ;;  %p283_p0 = scmp.ne.s32.totalorder %s225_s8, %s282_s3  ;;  %p287_p1 = scmp.lt.s32.totalorder %s225_s8, %s225_s8 }
   0xd   :  { %p288_p2 = scmp.lt.s32.totalorder %s286_s9, %s282_s3 }
   0xe   :  { %130 = vperm.xlu0 %274, %v127_v10  }
   0xf   :  { %p289_p3 = por %p288_p2, %p287_p1 }
  0x11   :  { %p290_p4 = pnand %p289_p3, %p283_p0 }
  0x85   :  { %v36_v14 = vpop.permute.xlu0 %35 }
  0x86   :  { %v46_v13 = vpop.permute.xlu1 %45 }
  0x89   :  { %v41_v21 = vpop.permute.xlu0 %40 }
  0x8a   :  { %v51_v16 = vpop.permute.xlu1 %50 }
  0x8d   :  { %v131_v35 = vpop.permute.xlu0 %130 }
  0x8e   :  { %v136_v36 = vrot.slane %v131_v35, %v135_v34 }
  0xdf   :  { %v249_v15 = vpop.f32.mrb[0].mxu0 }
  0xe0   :  { %v116_v17 = vadd.f32 %v249_v15, %v46_v13  ;;  %v107_v18 = vpop.f32.mrb[1].mxu0 }
  0xe1   :  { %v108_v19 = vadd.f32 %v107_v18, %v36_v14  ;;  %v250_v20 = vpop.f32.mrb[2].mxu0 }
  0xe2   :  { %v119_v22 = vadd.f32 %v250_v20, %v51_v16  ;;  %v110_v23 = vpop.f32.mrb[3].mxu0  ;;  %v124_v25 = vmax.f32 %v116_v17, 0.0 }
  0xe3   :  { %v111_v24 = vadd.f32 %v110_v23, %v41_v21  ;;  %v122_v27 = vmax.f32 %v108_v19, 0.0 }
  0xe4   :  { %v125_v26 = vmax.f32 %v119_v22, 0.0 }
  0xe5   :  { %v123_v28 = vmax.f32 %v111_v24, 0.0 }
  0xe6   :  { %v266_v29 = vpack.c.bf16 %v125_v26, %v124_v25 }
  0xe7   :  { %v263_v30 = vpack.c.bf16 %v123_v28, %v122_v27 }
  0xe9   :  { %264 = vmatpush3.bf16.msra.mxu1 %v263_v30 }
  0xea   :  { %265 = vmatprep.subr.bf16.mxu1 %v307_v11 }
  0xed   :  { %267 = vmatpush3.bf16.msra.mxu1 %v266_v29 }
  0xf0   :  { %260 = vmatmul.mubr.msk.f32.vlgmr.msra.gmra.mrb[0].mxu1 %vm137_vm2, %v126_v31 }
 0x1c3   :  { %v207_v37 = vpop.f32.mrb[0].mxu1 }
 0x1c4   :  { %v208_v38 = vadd.f32 %v207_v37, %v136_v36  ;;  %v261_v39 = vpop.f32.mrb[1].mxu1 }
 0x1c6   :  { %v211_v40 = vsub.f32 0.0, %v208_v38 }
 0x1c8   :  { %v212_v41 = vmul.f32 1.442695, %v211_v40 }
 0x1ca   :  { %278 = vpow2.f32 %v212_v41 }
 0x1d4   :  { %v279_v42 = vpop.eup %278 }
 0x1d5   :  { %v214_v43 = vadd.f32 1.0, %v279_v42 }
 0x1d7   :  { %280 = vrcp.f32 %v214_v43 }
 0x1e1   :  { %v281_v44 = vpop.eup %280 }
 0x1e2   :  { %217 = vst.msk [vmem:[#allocation3] sm:$0x1] %vm216_vm3, %v281_v44 }
 0x1e3   :  { %293 = shalt.err (!%p290_p4)
}
 0x1e4   :  { %s294_s12 = scalar_lea.hbm %s389_s5, 16 }
 0x1e5   :  { %p295_p5 = scmp.ne.s32.totalorder %s389_s5, %s294_s12  ;;  %p298_p6 = scmp.lt.u32.totalorder %s294_s12, %s389_s5 }
 0x1e7   :  { %p300_p7 = pnand %p298_p6, %p295_p5 }
 0x1e9   :  { %303 = shalt.err (!%p300_p7)
}
 0x1ea   :  { %227 = dma.vmem_to_hbm [thread:$0]  %s225_s8, 16, %s389_s5, [#allocation4]  }
 0x1eb   :  { %304 = dma.done.wait [#allocation4], 16  }
 0x1ec   :  { %305 = vsyncadd [#allocation4], 4294967280 }
 0x1ed   :  { %231 = vsyncpa [#allocation4], 1 }

</bundles_post_ra>
